<compile_context>
chip_gen: v7x
topology: tpu7x:2x2x1
jax: 0.10.0
libtpu: 0.0.40
codegen_flags: <defaults>
</compile_context>

<pallas_src>
import functools

import jax
import jax.numpy as jnp
from jax.experimental import pallas as pl
from jax.experimental.pallas import tpu as pltpu

EPS = 1e-6  # basicsr channels-first LayerNorm default eps


# ---------------------------------------------------------------------------
# Small helpers
# ---------------------------------------------------------------------------
def _gelu_exact(x):
    # PyTorch nn.GELU() default = exact erf formulation (kept for parity).
    return 0.5 * x * (1.0 + jax.lax.erf(x * 0.7071067811865476))


def _vmem_budget_bytes():
    """Generation-aware scoped-VMEM cap: ~0.65x physical VMEM, clamped."""
    cap = 64 * 1024 * 1024  # conservative default (v7x per-TC VMEM)
    try:
        info = pltpu.get_tpu_info()
        cap = int(getattr(info, "vmem_capacity_bytes", cap))
    except Exception:
        pass
    budget = int(cap * 0.65)
    return max(32 * 1024 * 1024, min(budget, 100 * 1024 * 1024))


def _round_up(a, m):
    return -(-a // m) * m


def _pick_hw_tile(HW, C, tile_target_bytes):
    """Pick a lane-dense spatial tile (multiple of 128, preferring 256) sized
    from the real per-step footprint.  Returns (THW, HW_padded)."""
    hw128 = _round_up(HW, 128)
    cap = max(256, (tile_target_bytes // (4 * C)) // 256 * 256)
    if hw128 <= cap:
        return hw128, hw128
    t = (cap // 128) * 128
    # Prefer a divisor of hw128 (minimal padding) if one exists near the cap.
    d = t
    best = 0
    while d >= 128:
        if hw128 % d == 0:
            best = d
            break
        d -= 128
    if best >= max(256, t // 2):
        return best, hw128
    # Otherwise accept up to (t-1) columns of extra zero padding.
    return t, _round_up(HW, t)


def _layernorm_cf(x, gamma, beta, inv_c):
    """Channels-first LayerNorm over the sublane (C) axis of a (C, HW) tile."""
    u = jnp.sum(x, axis=0, keepdims=True) * inv_c
    d = x - u
    s = jnp.sum(d * d, axis=0, keepdims=True) * inv_c
    return (d * jax.lax.rsqrt(s + EPS)) * gamma + beta


# ---------------------------------------------------------------------------
# Fused single-pass kernel: one (C, HW) slab per batch, x read once.
# ---------------------------------------------------------------------------
def _fused_kernel(x_ref, pk_ref, wg_ref, wl_ref, wc_ref, out_ref,
                  *, R, inv_c, inv_hw):
    pk = pk_ref[...]
    gamma, beta = pk[:, 0:1], pk[:, 1:2]
    bc = pk[:, 2:3]
    bg = pk[:R, 3:4]
    bl = pk[:R, 4:5]
    ws_loc = pk[:R, 5:6]
    ws_glb = pk[:R, 6:7]
    bs = pk[0:1, 7:8]

    x = x_ref[0]                                              # (C, HW)

    # LayerNorm (channels-first).  Keep the un-affined 'norm' so the spatial
    # pool is pad-safe (zero columns pool to exactly 0) and apply the affine
    # once at the pooled (C,1) level; the local branch still needs xn.
    u = jnp.sum(x, axis=0, keepdims=True) * inv_c
    d = x - u
    s = jnp.sum(d * d, axis=0, keepdims=True) * inv_c
    norm = d * jax.lax.rsqrt(s + EPS)                         # (C, HW)
    xn = norm * gamma + beta                                  # (C, HW)

    # Global branch: adaptive_avg_pool2d -> global_reduce -> GELU
    xg = gamma * (jnp.sum(norm, axis=-1, keepdims=True) * inv_hw) + beta   # (C,1)
    g = _gelu_exact(
        jnp.dot(wg_ref[...], xg, preferred_element_type=jnp.float32) + bg)     # (R,1)
    # channel_select (R->C) + sigmoid
    c_attn = jax.nn.sigmoid(
        jnp.dot(wc_ref[...], g, preferred_element_type=jnp.float32) + bc)      # (C,1)
    # global half of spatial_select (scalar per batch), on the VPU
    sglb = jnp.sum(ws_glb * g, axis=0, keepdims=True) + bs                     # (1,1)

    # Local branch: local_reduce (C->R) + GELU, HW stays in the lane dim.
    loc = _gelu_exact(
        jnp.dot(wl_ref[...], xn, preferred_element_type=jnp.float32) + bl)     # (R,HW)
    # local half of spatial_select: broadcast-mul + sublane reduce (no MXU)
    s_attn = jax.nn.sigmoid(jnp.sum(loc * ws_loc, axis=0, keepdims=True) + sglb)  # (1,HW)

    # Modulate the ORIGINAL input; factored to avoid a full (C,HW) attn temp.
    out_ref[0] = (x * s_attn) * c_attn


# ---------------------------------------------------------------------------
# Two-pass tiled fallback (large C*HW).
# Pass 1: per-batch global branch -> channel attention + global spatial term.
# ---------------------------------------------------------------------------
def _stage1_kernel(x_ref, pk_ref, wg_ref, wc_ref, cattn_ref, sglb_ref, acc_ref,
                   *, R, inv_c, inv_hw):
    t = pl.program_id(1)

    @pl.when(t == 0)
    def _():
        acc_ref[...] = jnp.zeros_like(acc_ref)

    # Deferred-affine LayerNorm: accumulate the spatial sum of the un-affined
    # normalization only (zero-padded columns contribute exactly 0).
    x = x_ref[0]                                              # (C, THW)
    u = jnp.sum(x, axis=0, keepdims=True) * inv_c
    d = x - u
    s = jnp.sum(d * d, axis=0, keepdims=True) * inv_c
    norm = d * jax.lax.rsqrt(s + EPS)
    acc_ref[...] += jnp.sum(norm, axis=-1, keepdims=True)     # (C, 1)

    @pl.when(t == pl.num_programs(1) - 1)
    def _():
        pk = pk_ref[...]
        gamma, beta = pk[:, 0:1], pk[:, 1:2]
        bc = pk[:, 2:3]
        bg = pk[:R, 3:4]
        ws_glb = pk[:R, 6:7]
        bs = pk[0:1, 7:8]
        # sum_hw(gamma*norm+beta)/HW == gamma*(sum_hw(norm)/HW) + beta
        xg = gamma * (acc_ref[...] * inv_hw) + beta           # (C, 1)
        g = _gelu_exact(
            jnp.dot(wg_ref[...], xg, preferred_element_type=jnp.float32) + bg)   # (R,1)
        cattn_ref[0] = jax.nn.sigmoid(
            jnp.dot(wc_ref[...], g, preferred_element_type=jnp.float32) + bc)    # (C,1)
        sglb_ref[0] = jnp.sum(ws_glb * g, axis=0, keepdims=True) + bs            # (1,1)


# Pass 2: per-tile local branch -> spatial attention and modulated output.
def _stage2_kernel(x_ref, pk_ref, wl_ref, cattn_ref, sglb_ref, out_ref,
                   *, R, inv_c):
    pk = pk_ref[...]
    gamma, beta = pk[:, 0:1], pk[:, 1:2]
    bl = pk[:R, 4:5]
    ws_loc = pk[:R, 5:6]

    x = x_ref[0]                                              # (C, THW)
    xn = _layernorm_cf(x, gamma, beta, inv_c)                 # (C, THW)

    loc = _gelu_exact(
        jnp.dot(wl_ref[...], xn, preferred_element_type=jnp.float32) + bl)       # (R, THW)
    s_loc = jnp.sum(loc * ws_loc, axis=0, keepdims=True)      # (1, THW)
    s_attn = jax.nn.sigmoid(s_loc + sglb_ref[0])              # (1, THW)

    out_ref[0] = (x * s_attn) * cattn_ref[0]


# ---------------------------------------------------------------------------
# Wrapper
# ---------------------------------------------------------------------------
def _pack_small_params(gamma, beta, wg, bg, bl, bc, ws, bs, C, R):
    #   col 0: gamma  col 1: beta  col 2: bc  col 3: bg  col 4: bl
    #   col 5: ws[:R] (local half)  col 6: ws[R:] (global half)  col 7[0]: bs
    pk = jnp.zeros((C, 8), jnp.float32)
    pk = pk.at[:, 0].set(gamma).at[:, 1].set(beta).at[:, 2].set(bc)
    pk = pk.at[:R, 3].set(bg).at[:R, 4].set(bl)
    pk = pk.at[:R, 5].set(ws[:R]).at[:R, 6].set(ws[R:])
    pk = pk.at[0, 7].set(bs[0])
    return pk


def biattn_pallas(x_nchw, params, *, hw_tile=None, force_tiled=False):
    """x_nchw: (B, C, H, W) float32.  Returns (B, C, H, W)."""
    gamma, beta, wg, bg, wl, bl, wc, bc, ws, bs = params
    B, C, H, W = x_nchw.shape
    HW = H * W
    R = wg.shape[0]
    x = x_nchw.reshape(B, C, HW)                 # channels-first, HW in lane dim

    vmem_limit = _vmem_budget_bytes()
    pk = _pack_small_params(gamma, beta, wg, bg, bl, bc, ws, bs, C, R)

    slab_bytes = C * HW * 4
    # Fused footprint ~ 2x in + 2x out + xn + d + loc + small  ->  ~7x slab.
    use_fused = (not force_tiled) and (7 * slab_bytes <= vmem_limit)

    if use_fused:
        fused = functools.partial(_fused_kernel, R=R, inv_c=1.0 / C, inv_hw=1.0 / HW)
        out = pl.pallas_call(
            fused,
            out_shape=jax.ShapeDtypeStruct((B, C, HW), x.dtype),
            grid_spec=pltpu.PrefetchScalarGridSpec(
                num_scalar_prefetch=0,
                grid=(B,),
                in_specs=[
                    pl.BlockSpec((1, C, HW), lambda b: (b, 0, 0)),   # x (full extent)
                    pl.BlockSpec((C, 8), lambda b: (0, 0)),          # packed small params
                    pl.BlockSpec((R, C), lambda b: (0, 0)),          # global_reduce weight
                    pl.BlockSpec((R, C), lambda b: (0, 0)),          # local_reduce weight
                    pl.BlockSpec((C, R), lambda b: (0, 0)),          # channel_select weight
                ],
                out_specs=pl.BlockSpec((1, C, HW), lambda b: (b, 0, 0)),
            ),
            compiler_params=pltpu.CompilerParams(
                dimension_semantics=("parallel",),
                vmem_limit_bytes=vmem_limit),
        )(x, pk, wg, wl, wc)
        return out.reshape(B, C, H, W)

    # ----- two-pass tiled fallback -----
    tile_target = max(512 * 1024, vmem_limit // 6)
    if hw_tile is not None:
        THW = hw_tile
        HW_pad = _round_up(HW, THW)
    else:
        THW, HW_pad = _pick_hw_tile(HW, C, tile_target)
    nt = HW_pad // THW

    if HW_pad != HW:
        # Zero columns contribute 0 to the pooled sum (deferred affine) and
        # produce 0 outputs (x==0 there); sliced off below.
        x = jnp.pad(x, ((0, 0), (0, 0), (0, HW_pad - HW)))

    stage1 = functools.partial(_stage1_kernel, R=R, inv_c=1.0 / C, inv_hw=1.0 / HW)
    c_attn, sglb = pl.pallas_call(
        stage1,
        out_shape=(jax.ShapeDtypeStruct((B, C, 1), jnp.float32),
                   jax.ShapeDtypeStruct((B, 1, 1), jnp.float32)),
        grid_spec=pltpu.PrefetchScalarGridSpec(
            num_scalar_prefetch=0,
            grid=(B, nt),
            in_specs=[
                pl.BlockSpec((1, C, THW), lambda b, t: (b, 0, t)),   # x
                pl.BlockSpec((C, 8), lambda b, t: (0, 0)),           # packed small params
                pl.BlockSpec((R, C), lambda b, t: (0, 0)),           # global_reduce weight
                pl.BlockSpec((C, R), lambda b, t: (0, 0)),           # channel_select weight
            ],
            out_specs=[
                pl.BlockSpec((1, C, 1), lambda b, t: (b, 0, 0)),     # c_attn
                pl.BlockSpec((1, 1, 1), lambda b, t: (b, 0, 0)),     # global spatial term
            ],
            scratch_shapes=[pltpu.VMEM((C, 1), jnp.float32)],        # spatial-sum accumulator
        ),
        compiler_params=pltpu.CompilerParams(
            dimension_semantics=("parallel", "arbitrary"),
            vmem_limit_bytes=vmem_limit),
    )(x, pk, wg, wc)

    stage2 = functools.partial(_stage2_kernel, R=R, inv_c=1.0 / C)
    out = pl.pallas_call(
        stage2,
        out_shape=jax.ShapeDtypeStruct((B, C, HW_pad), x.dtype),
        grid_spec=pltpu.PrefetchScalarGridSpec(
            num_scalar_prefetch=0,
            grid=(B, nt),
            in_specs=[
                pl.BlockSpec((1, C, THW), lambda b, t: (b, 0, t)),   # x
                pl.BlockSpec((C, 8), lambda b, t: (0, 0)),           # packed small params
                pl.BlockSpec((R, C), lambda b, t: (0, 0)),           # local_reduce weight
                pl.BlockSpec((1, C, 1), lambda b, t: (b, 0, 0)),     # c_attn (per batch)
                pl.BlockSpec((1, 1, 1), lambda b, t: (b, 0, 0)),     # global spatial term
            ],
            out_specs=pl.BlockSpec((1, C, THW), lambda b, t: (b, 0, t)),
        ),
        compiler_params=pltpu.CompilerParams(
            dimension_semantics=("parallel", "parallel"),
            vmem_limit_bytes=vmem_limit),
    )(x, pk, wl, c_attn, sglb)

    if HW_pad != HW:
        out = out[:, :, :HW]
    return out.reshape(B, C, H, W)


# ---------------------------------------------------------------------------
# Plain-JAX reference mirroring the PyTorch forward (for verification)
# ---------------------------------------------------------------------------
def biattn_reference(x, params):
    gamma, beta, wg, bg, wl, bl, wc, bc, ws, bs = params
    B, C, H, W = x.shape
    u = jnp.mean(x, axis=1, keepdims=True)
    d = x - u
    s = jnp.mean(d * d, axis=1, keepdims=True)
    xn = d / jnp.sqrt(s + EPS)
    xn = gamma[None, :, None, None] * xn + beta[None, :, None, None]

    xg = jnp.mean(xn, axis=(2, 3), keepdims=True)                                      # (B,C,1,1)
    g = _gelu_exact(jnp.einsum('rc,bcij->brij', wg, xg) + bg[None, :, None, None])     # (B,R,1,1)
    loc = _gelu_exact(jnp.einsum('rc,bchw->brhw', wl, xn) + bl[None, :, None, None])   # (B,R,H,W)
    c_attn = jax.nn.sigmoid(jnp.einsum('cr,brij->bcij', wc, g) + bc[None, :, None, None])
    R = wg.shape[0]
    cat = jnp.concatenate([loc, jnp.broadcast_to(g, (B, R, H, W))], axis=1)            # (B,2R,H,W)
    s_attn = jax.nn.sigmoid(jnp.einsum('r,brhw->bhw', ws, cat)[:, None] + bs[0])       # (B,1,H,W)
    return x * (c_attn * s_attn)


def make_params(key, C, act_ratio=0.25):
    """Synthetic parameters matching the PyTorch module shapes.
    Conv2d 1x1 weights (out, in, 1, 1) are stored as (out, in) matrices."""
    R = int(C * act_ratio)
    ks = jax.random.split(key, 10)
    gamma = 1.0 + 0.1 * jax.random.normal(ks[0], (C,), jnp.float32)   # LayerNorm.weight
    beta = 0.1 * jax.random.normal(ks[1], (C,), jnp.float32)          # LayerNorm.bias
    wg = 0.1 * jax.random.normal(ks[2], (R, C), jnp.float32)          # global_reduce
    bg = 0.1 * jax.random.normal(ks[3], (R,), jnp.float32)
    wl = 0.1 * jax.random.normal(ks[4], (R, C), jnp.float32)          # local_reduce
    bl = 0.1 * jax.random.normal(ks[5], (R,), jnp.float32)
    wc = 0.1 * jax.random.normal(ks[6], (C, R), jnp.float32)          # channel_select
    bc = 0.1 * jax.random.normal(ks[7], (C,), jnp.float32)
    ws = 0.1 * jax.random.normal(ks[8], (2 * R,), jnp.float32)        # spatial_select
    bs = 0.1 * jax.random.normal(ks[9], (1,), jnp.float32)
    return (gamma, beta, wg, bg, wl, bl, wc, bc, ws, bs)


if __name__ == "__main__":
    key = jax.random.PRNGKey(0)
    kx, kp, kx2, kp2 = jax.random.split(key, 4)

    # 1) small aligned shape -> fused single-pass path
    B, C, H, W = 2, 32, 16, 16          # reduce_channels = 8, HW = 256 (lane-dense)
    x = jax.random.normal(kx, (B, C, H, W), jnp.float32)
    params = make_params(kp, C)

    out_fused = jax.block_until_ready(biattn_pallas(x, params))
    ref = biattn_reference(x, params)
    assert out_fused.shape == (B, C, H, W)
    err = float(jnp.max(jnp.abs(out_fused - ref)))
    assert jnp.allclose(out_fused, ref, atol=2e-4, rtol=2e-4), f"fused mismatch, max_err={err}"

    # 2) same shape forced through the two-pass tiled fallback
    out_tiled = jax.block_until_ready(biattn_pallas(x, params, force_tiled=True, hw_tile=128))
    err = float(jnp.max(jnp.abs(out_tiled - ref)))
    assert jnp.allclose(out_tiled, ref, atol=2e-4, rtol=2e-4), f"tiled mismatch, max_err={err}"

    # 3) non-128-aligned spatial size (fused path, full-extent block, no padding)
    B2, C2, H2, W2 = 1, 20, 10, 10
    x2 = jax.random.normal(kx2, (B2, C2, H2, W2), jnp.float32)
    params2 = make_params(kp2, C2)
    out2 = jax.block_until_ready(biattn_pallas(x2, params2))
    ref2 = biattn_reference(x2, params2)
    err = float(jnp.max(jnp.abs(out2 - ref2)))
    assert jnp.allclose(out2, ref2, atol=2e-4, rtol=2e-4), f"odd-shape mismatch, max_err={err}"

    print("KERNEL_OK")
</pallas_src>

<mosaic_0001>
module attributes {stable_mosaic.version = 11 : i64} {
  func.func @_fused_kernel(%arg0: i32, %arg1: memref<1x32x256xf32, #tpu.memory_space<vmem>>, %arg2: memref<32x8xf32, #tpu.memory_space<vmem>>, %arg3: memref<8x32xf32, #tpu.memory_space<vmem>>, %arg4: memref<8x32xf32, #tpu.memory_space<vmem>>, %arg5: memref<32x8xf32, #tpu.memory_space<vmem>>, %arg6: memref<1x32x256xf32, #tpu.memory_space<vmem>>) attributes {dimension_semantics = [#tpu.dimension_semantics<parallel>], iteration_bounds = array<i64: 2>, scalar_prefetch = 0 : i64, scratch_operands = 0 : i64, tpu.core_type = #tpu.core_type<tc>, window_params = [{transform_indices = @transform_0, window_bounds = array<i64: 1, 32, 256>}, {pipeline_mode = #tpu.pipeline_mode<synchronous>, transform_indices = @transform_1, window_bounds = array<i64: 32, 8>}, {pipeline_mode = #tpu.pipeline_mode<synchronous>, transform_indices = @transform_2, window_bounds = array<i64: 8, 32>}, {pipeline_mode = #tpu.pipeline_mode<synchronous>, transform_indices = @transform_3, window_bounds = array<i64: 8, 32>}, {pipeline_mode = #tpu.pipeline_mode<synchronous>, transform_indices = @transform_4, window_bounds = array<i64: 32, 8>}, {transform_indices = @transform_5, window_bounds = array<i64: 1, 32, 256>}]} {
    %c0 = arith.constant 0 : index
    %c0_0 = arith.constant 0 : index
    %0 = vector.load %arg2[%c0, %c0_0] : memref<32x8xf32, #tpu.memory_space<vmem>>, vector<32x8xf32>
    %1 = vector.extract_strided_slice %0 {offsets = [0, 0], sizes = [32, 1], strides = [1, 1]} : vector<32x8xf32> to vector<32x1xf32>
    %2 = vector.extract_strided_slice %0 {offsets = [0, 1], sizes = [32, 1], strides = [1, 1]} : vector<32x8xf32> to vector<32x1xf32>
    %3 = vector.extract_strided_slice %0 {offsets = [0, 2], sizes = [32, 1], strides = [1, 1]} : vector<32x8xf32> to vector<32x1xf32>
    %4 = vector.extract_strided_slice %0 {offsets = [0, 3], sizes = [8, 1], strides = [1, 1]} : vector<32x8xf32> to vector<8x1xf32>
    %5 = vector.extract_strided_slice %0 {offsets = [0, 4], sizes = [8, 1], strides = [1, 1]} : vector<32x8xf32> to vector<8x1xf32>
    %6 = vector.extract_strided_slice %0 {offsets = [0, 5], sizes = [8, 1], strides = [1, 1]} : vector<32x8xf32> to vector<8x1xf32>
    %7 = vector.extract_strided_slice %0 {offsets = [0, 6], sizes = [8, 1], strides = [1, 1]} : vector<32x8xf32> to vector<8x1xf32>
    %8 = vector.extract_strided_slice %0 {offsets = [0, 7], sizes = [1, 1], strides = [1, 1]} : vector<32x8xf32> to vector<1x1xf32>
    %c0_1 = arith.constant 0 : index
    %c0_2 = arith.constant 0 : index
    %c0_3 = arith.constant 0 : index
    %9 = vector.load %arg1[%c0_1, %c0_2, %c0_3] : memref<1x32x256xf32, #tpu.memory_space<vmem>>, vector<1x32x256xf32>
    %10 = vector.shape_cast %9 : vector<1x32x256xf32> to vector<32x256xf32>
    %cst = arith.constant dense<0.000000e+00> : vector<256xf32>
    %11 = vector.multi_reduction <add>, %10, %cst [0] : vector<32x256xf32> to vector<256xf32>
    %12 = vector.shape_cast %11 : vector<256xf32> to vector<1x256xf32>
    %cst_4 = arith.constant 3.125000e-02 : f32
    %13 = vector.broadcast %cst_4 : f32 to vector<1x256xf32>
    %14 = arith.mulf %12, %13 : vector<1x256xf32>
    %15 = vector.broadcast %14 : vector<1x256xf32> to vector<32x256xf32>
    %16 = arith.subf %10, %15 : vector<32x256xf32>
    %17 = arith.mulf %16, %16 : vector<32x256xf32>
    %cst_5 = arith.constant dense<0.000000e+00> : vector<256xf32>
    %18 = vector.multi_reduction <add>, %17, %cst_5 [0] : vector<32x256xf32> to vector<256xf32>
    %19 = vector.shape_cast %18 : vector<256xf32> to vector<1x256xf32>
    %cst_6 = arith.constant 3.125000e-02 : f32
    %20 = vector.broadcast %cst_6 : f32 to vector<1x256xf32>
    %21 = arith.mulf %19, %20 : vector<1x256xf32>
    %cst_7 = arith.constant 9.99999997E-7 : f32
    %22 = vector.broadcast %cst_7 : f32 to vector<1x256xf32>
    %23 = arith.addf %21, %22 : vector<1x256xf32>
    %24 = math.rsqrt %23 : vector<1x256xf32>
    %25 = vector.broadcast %24 : vector<1x256xf32> to vector<32x256xf32>
    %26 = arith.mulf %16, %25 : vector<32x256xf32>
    %27 = vector.broadcast %1 : vector<32x1xf32> to vector<32x256xf32>
    %28 = arith.mulf %26, %27 : vector<32x256xf32>
    %29 = vector.broadcast %2 : vector<32x1xf32> to vector<32x256xf32>
    %30 = arith.addf %28, %29 : vector<32x256xf32>
    %cst_8 = arith.constant dense<0.000000e+00> : vector<32xf32>
    %31 = vector.multi_reduction <add>, %26, %cst_8 [1] : vector<32x256xf32> to vector<32xf32>
    %32 = vector.shape_cast %31 : vector<32xf32> to vector<32x1xf32>
    %cst_9 = arith.constant 3.906250e-03 : f32
    %33 = vector.broadcast %cst_9 : f32 to vector<32x1xf32>
    %34 = arith.mulf %32, %33 : vector<32x1xf32>
    %35 = arith.mulf %1, %34 : vector<32x1xf32>
    %36 = arith.addf %35, %2 : vector<32x1xf32>
    %c0_10 = arith.constant 0 : index
    %c0_11 = arith.constant 0 : index
    %37 = vector.load %arg3[%c0_10, %c0_11] : memref<8x32xf32, #tpu.memory_space<vmem>>, vector<8x32xf32>
    %cst_12 = arith.constant dense<0.000000e+00> : vector<8x1xf32>
    %38 = tpu.matmul %37, %36, %cst_12 {dimension_numbers = #tpu.dot_dimension_numbers<[1], [0], [0], [1], [0, 0, 1, 1], [], []>} : vector<8x32xf32>, vector<32x1xf32>, vector<8x1xf32> -> vector<8x1xf32>
    %39 = arith.addf %38, %4 : vector<8x1xf32>
    %cst_13 = arith.constant 5.000000e-01 : f32
    %40 = vector.broadcast %cst_13 : f32 to vector<8x1xf32>
    %41 = arith.mulf %40, %39 : vector<8x1xf32>
    %cst_14 = arith.constant 0.707106769 : f32
    %42 = vector.broadcast %cst_14 : f32 to vector<8x1xf32>
    %43 = arith.mulf %39, %42 : vector<8x1xf32>
    %44 = math.erf %43 : vector<8x1xf32>
    %cst_15 = arith.constant 1.000000e+00 : f32
    %45 = vector.broadcast %cst_15 : f32 to vector<8x1xf32>
    %46 = arith.addf %45, %44 : vector<8x1xf32>
    %47 = arith.mulf %41, %46 : vector<8x1xf32>
    %c0_16 = arith.constant 0 : index
    %c0_17 = arith.constant 0 : index
    %48 = vector.load %arg5[%c0_16, %c0_17] : memref<32x8xf32, #tpu.memory_space<vmem>>, vector<32x8xf32>
    %cst_18 = arith.constant dense<0.000000e+00> : vector<32x1xf32>
    %49 = tpu.matmul %48, %47, %cst_18 {dimension_numbers = #tpu.dot_dimension_numbers<[1], [0], [0], [1], [0, 0, 1, 1], [], []>} : vector<32x8xf32>, vector<8x1xf32>, vector<32x1xf32> -> vector<32x1xf32>
    %50 = arith.addf %49, %3 : vector<32x1xf32>
    %51 = arith.negf %50 : vector<32x1xf32>
    %52 = math.exp %51 : vector<32x1xf32>
    %cst_19 = arith.constant 1.000000e+00 : f32
    %53 = vector.broadcast %cst_19 : f32 to vector<32x1xf32>
    %54 = arith.addf %53, %52 : vector<32x1xf32>
    %55 = arith.divf %53, %54 : vector<32x1xf32>
    %56 = arith.mulf %7, %47 : vector<8x1xf32>
    %cst_20 = arith.constant dense<0.000000e+00> : vector<1xf32>
    %57 = vector.multi_reduction <add>, %56, %cst_20 [0] : vector<8x1xf32> to vector<1xf32>
    %58 = vector.shape_cast %57 : vector<1xf32> to vector<1x1xf32>
    %59 = arith.addf %58, %8 : vector<1x1xf32>
    %c0_21 = arith.constant 0 : index
    %c0_22 = arith.constant 0 : index
    %60 = vector.load %arg4[%c0_21, %c0_22] : memref<8x32xf32, #tpu.memory_space<vmem>>, vector<8x32xf32>
    %cst_23 = arith.constant dense<0.000000e+00> : vector<8x256xf32>
    %61 = tpu.matmul %60, %30, %cst_23 {dimension_numbers = #tpu.dot_dimension_numbers<[1], [0], [0], [1], [0, 0, 1, 1], [], []>} : vector<8x32xf32>, vector<32x256xf32>, vector<8x256xf32> -> vector<8x256xf32>
    %62 = vector.broadcast %5 : vector<8x1xf32> to vector<8x256xf32>
    %63 = arith.addf %61, %62 : vector<8x256xf32>
    %cst_24 = arith.constant 5.000000e-01 : f32
    %64 = vector.broadcast %cst_24 : f32 to vector<8x256xf32>
    %65 = arith.mulf %64, %63 : vector<8x256xf32>
    %cst_25 = arith.constant 0.707106769 : f32
    %66 = vector.broadcast %cst_25 : f32 to vector<8x256xf32>
    %67 = arith.mulf %63, %66 : vector<8x256xf32>
    %68 = math.erf %67 : vector<8x256xf32>
    %cst_26 = arith.constant 1.000000e+00 : f32
    %69 = vector.broadcast %cst_26 : f32 to vector<8x256xf32>
    %70 = arith.addf %69, %68 : vector<8x256xf32>
    %71 = arith.mulf %65, %70 : vector<8x256xf32>
    %72 = vector.broadcast %6 : vector<8x1xf32> to vector<8x256xf32>
    %73 = arith.mulf %71, %72 : vector<8x256xf32>
    %cst_27 = arith.constant dense<0.000000e+00> : vector<256xf32>
    %74 = vector.multi_reduction <add>, %73, %cst_27 [0] : vector<8x256xf32> to vector<256xf32>
    %75 = vector.shape_cast %74 : vector<256xf32> to vector<1x256xf32>
    %76 = vector.broadcast %59 : vector<1x1xf32> to vector<1x256xf32>
    %77 = arith.addf %75, %76 : vector<1x256xf32>
    %78 = arith.negf %77 : vector<1x256xf32>
    %79 = math.exp %78 : vector<1x256xf32>
    %cst_28 = arith.constant 1.000000e+00 : f32
    %80 = vector.broadcast %cst_28 : f32 to vector<1x256xf32>
    %81 = arith.addf %80, %79 : vector<1x256xf32>
    %82 = arith.divf %80, %81 : vector<1x256xf32>
    %83 = vector.broadcast %82 : vector<1x256xf32> to vector<32x256xf32>
    %84 = arith.mulf %10, %83 : vector<32x256xf32>
    %85 = vector.broadcast %55 : vector<32x1xf32> to vector<32x256xf32>
    %86 = arith.mulf %84, %85 : vector<32x256xf32>
    %c0_29 = arith.constant 0 : index
    %c0_30 = arith.constant 0 : index
    %c0_31 = arith.constant 0 : index
    %87 = vector.load %arg6[%c0_29, %c0_30, %c0_31] : memref<1x32x256xf32, #tpu.memory_space<vmem>>, vector<1x32x256xf32>
    %88 = vector.shape_cast %87 : vector<1x32x256xf32> to vector<32x256xf32>
    %89 = vector.shape_cast %86 : vector<32x256xf32> to vector<1x32x256xf32>
    tpu.vector_store %arg6[%c0_29, %c0_30, %c0_31], %89 {strides = array<i32>} : memref<1x32x256xf32, #tpu.memory_space<vmem>>, vector<1x32x256xf32>,
    return
  }
  func.func @transform_0(%arg0: i32) -> (i32, i32, i32) {
    %c0_i32 = arith.constant 0 : i32
    %c0_i32_0 = arith.constant 0 : i32
    %c0_i32_1 = arith.constant 0 : i32
    return %arg0, %c0_i32, %c0_i32_0 : i32, i32, i32
  }
  func.func @transform_1(%arg0: i32) -> (i32, i32) {
    %c0_i32 = arith.constant 0 : i32
    %c0_i32_0 = arith.constant 0 : i32
    %c0_i32_1 = arith.constant 0 : i32
    return %c0_i32, %c0_i32_0 : i32, i32
  }
  func.func @transform_2(%arg0: i32) -> (i32, i32) {
    %c0_i32 = arith.constant 0 : i32
    %c0_i32_0 = arith.constant 0 : i32
    %c0_i32_1 = arith.constant 0 : i32
    return %c0_i32, %c0_i32_0 : i32, i32
  }
  func.func @transform_3(%arg0: i32) -> (i32, i32) {
    %c0_i32 = arith.constant 0 : i32
    %c0_i32_0 = arith.constant 0 : i32
    %c0_i32_1 = arith.constant 0 : i32
    return %c0_i32, %c0_i32_0 : i32, i32
  }
  func.func @transform_4(%arg0: i32) -> (i32, i32) {
    %c0_i32 = arith.constant 0 : i32
    %c0_i32_0 = arith.constant 0 : i32
    %c0_i32_1 = arith.constant 0 : i32
    return %c0_i32, %c0_i32_0 : i32, i32
  }
  func.func @transform_5(%arg0: i32) -> (i32, i32, i32) {
    %c0_i32 = arith.constant 0 : i32
    %c0_i32_0 = arith.constant 0 : i32
    %c0_i32_1 = arith.constant 0 : i32
    return %arg0, %c0_i32, %c0_i32_0 : i32, i32, i32
  }
}

</mosaic_0001>

<bundles_post_ra>
// kernel: tpu_custom_call.1
= control target key start
LH: loop header
LB: loop body
LE: loop exit
PB: predicated region body
PF: predicated region fallthrough
CT: control target
= control target key end

     0   :  { %10 = vsyncpa [#allocation3], 0  ;;  %s1560_s0 = inlined_call_operand.hbm [shape: f32[2,32,256], index: 0, kind: input, shape index: {}]   ;;  %s1561_s1 = inlined_call_operand.vmem [shape: f32[32,8], index: 1, kind: input, shape index: {}]   ;;  %s1562_s2 = inlined_call_operand.vmem [shape: f32[8,32], index: 2, kind: input, shape index: {}]   ;;  %s1563_s3 = inlined_call_operand.vmem [shape: f32[8,32], index: 3, kind: input, shape index: {}]   ;;  %s1564_s4 = inlined_call_operand.vmem [shape: f32[32,8], index: 4, kind: input, shape index: {}]   ;;  %s1565_s5 = inlined_call_operand.hbm [shape: f32[2,32,256], index: 5, kind: output, shape index: {}]  }
   0x1   :  { %12 = vsyncpa [#allocation3 + $0x1], 0 }
   0x2   :  { %13 = vsyncpa [#allocation4], 0 }
   0x3   :  { %15 = vsyncpa [#allocation4 + $0x1], 0  ;;  %s1235_s18 = smov 0   ;;  %s1237_s19 = smov 0  }
   0x4   :  { %s1239_s20 = smov 0   ;;  %s1241_s21 = smov 0  }
   0x5 LB: > { %s1256_s22 = sadd.s32 4294967295, %s1185_s21   ;;  %s911_s23 = sadd.s32 4294967294, %s1185_s21   ;;  %s1185_s21 = sphi %s1241_s21, %s1578_s21   ;;  %s1181_s20 = sphi %s1239_s20, %s1577_s20   ;;  %s1177_s19 = sphi %s1237_s19, %s1576_s19   ;;  %s1173_s18 = sphi %s1235_s18, %s1575_s18  }
   0x6   : > { %s1260_s24 = sadd.s32 1, %s1185_s21   ;;  %s28_s25 = sadd.s32 1, %s1181_s20 }
   0x7   : > { %s25_s26 = ssub.s32 %s1185_s21, %s1260_s24  ;;  %p35_p0 = scmp.ne.s32.totalorder %s1181_s20, %s1177_s19 }
   0x8   : > { %p26_p1 = scmp.eq.s32.totalorder %s25_s26, 0  ;;  %p36_p2 = scmp.eq.s32.totalorder %s1185_s21, 0 }
   0x9   : > { %p41_p3 = scmp.ne.s32.totalorder %s1177_s19, %s1173_s18  ;;  %p42_p4 = scmp.eq.s32.totalorder %s1256_s22, 0 }
   0xa   : > { %s1272_s27 = scalar_select %p26_p1, %s1181_s20, %s28_s25  }
   0xb   : > { %p1274_p5 = por %p36_p2, %p35_p0  ;;  %p1278_p6 = por %p42_p4, %p41_p3 }
   0xc   : > { %p149_p7 = scmp.eq.s32.totalorder %s1256_s22, 1  ;;  %p155_p8 = scmp.eq.s32.totalorder %s911_s23, 1 }
   0xd   : > { %p994_p10 = scmp.lt.s32.totalorder %s1185_s21, 2  ;;  %s187_s7 = sand.u32 1, %s1181_s20  }
   0xe   : > { %p1285_p11 = por %p149_p7, %p35_p0  ;;  %p1289_p12 = por %p155_p8, %p41_p3 }
   0xf   : > { %s937_s8 = sshll.u32 %s1185_s21, 10  ;;  %s914_s9 = sshll.u32 %s187_s7, 6 }
  0x10   : > { %s1569_s30 = scalar_select %p1285_p11, 1, 0 }
  0x11   : > { %s1570_s6 = scalar_select %p1289_p12, 1, 0 }
  0x12   : > { %s1298_s12 = scalar_lea.hbm %s1560_s0, %s937_s8  ;;  %s191_s13 = scalar_lea.vmem [#allocation2], %s914_s9 }
  0x13   : > { %s198_s14 = sshll.u32 %s191_s13, 4  ;;  %p1302_p13 = pnand %p994_p10, %p1274_p5  ;;  %s1306_s14 = int_to_ptr.vmem [resolvable:$true] %s198_s14 }
  0x14   : > { %s1308_s16 = scalar_lea.sflag [#allocation3], %s187_s7  ;;  %s1089_s17 = scalar_lea.hbm %s1298_s12, 1024 }
  0x15   : > { %p1090_p0 = scmp.ne.s32.totalorder %s1298_s12, %s1089_s17  ;;  %p1091_p1 = pneg %p1302_p13 }
  0x16   : > { %s1094_s26 = scalar_lea.hbm %s1560_s0, 2048  ;;  %p1095_p4 = scmp.lt.u32.totalorder %s1298_s12, %s1560_s0 }
  0x17   : > { %p1092_p2 = pnand %p1091_p1, %p1090_p0  ;;  %p1096_p5 = scmp.lt.u32.totalorder %s1094_s26, %s1089_s17 }
  0x18   : > { %p1098_p8 = scmp.lt.u32.totalorder %s1089_s17, %s1298_s12 }
  0x19   : > { %p1093_p3 = pneg %p1092_p2  ;;  %p1097_p7 = por %p1096_p5, %p1095_p4 }
  0x1b   : > { %p1099_p10 = por %p1098_p8, %p1097_p7 }
  0x1d   : > { %p1100_p9 = pnand %p1099_p10, %p1093_p3 }
  0x1f   : > { %1103 = shalt.err (!%p1100_p9)
}
  0x20   : > { %s1104_s7 = scalar_lea.vmem %s1306_s14, 1024  ;;  %s1187_s9 = smov [#allocation2]  }
  0x21   : > { %p1105_p0 = scmp.ne.s32.totalorder %s1306_s14, %s1104_s7  ;;  %s1109_s10 = sshll.u32 %s1187_s9, 4  ;;  %s1110_s10 = int_to_ptr.vmem [resolvable:$false] %s1109_s10 }
  0x22   : > { %s1111_s11 = scalar_lea.vmem %s1110_s10, 2048  ;;  %p1112_p11 = scmp.lt.s32.totalorder %s1306_s14, %s1110_s10 }
  0x23   : > { %p1107_p2 = pnand %p1105_p0, %p1091_p1  ;;  %p1113_p4 = scmp.lt.s32.totalorder %s1111_s11, %s1104_s7 }
  0x25   : > { %p1108_p12 = pneg %p1107_p2  ;;  %p1114_p5 = por %p1113_p4, %p1112_p11 }
  0x27   : > { %p1115_p7 = pnand %p1114_p5, %p1108_p12 }
  0x29   : > { %1118 = shalt.err (!%p1115_p7)
}
  0x2a   : > { %s1188_s13 = smov 256   ;;  %s1189_s17 = smov 16  }
  0x2b   : > { %989 = dma.hbm_to_vmem [thread:$0]  (!%p1302_p13), %s1298_s12, 1024, %s1306_s14, %s1308_s16, %s1188_s13, %s1188_s13, %s1189_s17  }
  0x2c   : > { %p917_p9 = scmp.ge.s32.totalorder %s1185_s21, 1  ;;  %p206_p1 = scmp.lt.s32.totalorder %s1185_s21, 3 }
  0x2e   : > { %p207_p3 = pnand %p917_p9, %p206_p1 }
  0x2f   : > { %s1339_s23 = sand.u32 (!%p207_p3), 1, %s1177_s19  }
  0x30   : > { %210 = sbr.rel (%p207_p3) target bundleno = 905 (0x389), region = 40  ;;  %s918_s25 = sshll.u32 (!%p207_p3), %s1339_s23, 6 }
  0x31   : > { %s213_s26 = scalar_lea.sflag (!%p207_p3), [#allocation3], %s1339_s23  ;;  %s216_s28 = scalar_lea.vmem (!%p207_p3), [#allocation2], %s918_s25 }
  0x37   : > { %1164 = dma.done.wait (%p1278_p6), %s213_s26, 1024  }
  0x38   : > { %1166 = vsyncadd (%p1278_p6), %s213_s26, 4294966272  ;;  %v1352_v0 = vld [vmem:[%s1561_s1 + $0x8] sm:$0xff]  ;;  %v1354_v1 = vld [vmem:[%s216_s28] sm:$0xff]  ;;  %s1190_s15 = smov 127   ;;  %vm1192_vm0 = vmmov 0   ;;  %s1195_s11 = smov 125  }
  0x39   : > { %397 = vrot.lane.b32.xlu1 %v1352_v0, %s1190_s15  ;;  %v1358_v2 = vld [vmem:[%s216_s28 + $0x8] sm:$0xff]  ;;  %v1360_v3 = vld [vmem:[%s216_s28 + $0x10] sm:$0xff]  ;;  %v1362_v4 = vld [vmem:[%s216_s28 + $0x18] sm:$0xff]  ;;  %vm415_vm1 = vcmask 261120   ;;  %vm510_vm2 = vcmask 64512   ;;  %s1197_s12 = smov 126  }
  0x3a   : > { %v1367_v5 = vld [vmem:[%s1561_s1 + $0x10] sm:$0xff]  ;;  %v1369_v6 = vld [vmem:[%s216_s28 + $0x20] sm:$0xff]  ;;  %v1371_v7 = vld [vmem:[%s216_s28 + $0x28] sm:$0xff]  ;;  %v255_v8 = vadd.f32 %v1360_v3, %v1354_v1  ;;  %v264_v9 = vadd.f32 %v1362_v4, %v1358_v2  ;;  %s1200_s16 = smov 6   ;;  %vm637_vm3 = vcmask 56368   ;;  %s242_s13 = scalar_lea.vmem [#allocation5], %s918_s25 }
  0x3b   : > { %v1377_v10 = vld [vmem:[%s216_s28 + $0x30] sm:$0xff]  ;;  %v1379_v11 = vld [vmem:[%s216_s28 + $0x38] sm:$0xff]  ;;  %s838_s17 = sshll.u32 %s242_s13, 4  ;;  %s938_s26 = sshll.u32 %s1256_s22, 10  ;;  %s1507_s17 = int_to_ptr.vmem [resolvable:$true] %s838_s17 }
  0x3c   : > { %v256_v12 = vadd.f32 %v255_v8, %v1369_v6  ;;  %v265_v13 = vadd.f32 %v264_v9, %v1371_v7  ;;  %s1516_s28 = scalar_lea.hbm %s1565_s5, %s938_s26  ;;  %s1119_s14 = scalar_lea.vmem %s1507_s17, 1024 }
  0x3d   : > { %399 = vrot.lane.b32.xlu1 %v1367_v5, %s1190_s15  ;;  %p1120_p6 = scmp.ne.s32.totalorder %s1507_s17, %s1119_s14  ;;  %p1572_p11 = scmp.ne.s32.totalorder %s1569_s30, 0 }
  0x3e   : > { %v257_v14 = vadd.f32 %v256_v12, %v1377_v10  ;;  %v266_v15 = vadd.f32 %v265_v13, %v1379_v11 }
  0x3f   : > { %p1121_p12 = pnand %p1120_p6, %p1572_p11 }
  0x40   : > { %v258_v16 = vrot.slane %v257_v14, 4  ;;  %v267_v17 = vrot.slane %v266_v15, 4 }
  0x41   : > { %p1122_p13 = pneg %p1121_p12 }
  0x42   : > { %v259_v18 = vadd.f32 %v258_v16, %v257_v14  ;;  %v268_v19 = vadd.f32 %v267_v17, %v266_v15 }
  0x44   : > { %v260_v20 = vrot.slane %v259_v18, 2  ;;  %v269_v21 = vrot.slane %v268_v19, 2 }
  0x46   : > { %v261_v22 = vadd.f32 %v260_v20, %v259_v18  ;;  %v270_v23 = vadd.f32 %v269_v21, %v268_v19 }
  0x48   : > { %v262_v24 = vrot.slane %v261_v22, 1  ;;  %v271_v25 = vrot.slane %v270_v23, 1 }
  0x4a   : > { %v263_v26 = vadd.f32 %v262_v24, %v261_v22  ;;  %v272_v27 = vadd.f32 %v271_v25, %v270_v23 }
  0x4c   : > { %v273_v28 = vmul.f32 0.03125, %v263_v26  ;;  %v274_v29 = vmul.f32 0.03125, %v272_v27 }
  0x4e   : > { %v275_v30 = vsub.f32 %v1354_v1, %v273_v28  ;;  %v276_v31 = vsub.f32 %v1358_v2, %v274_v29  ;;  %v277_v32 = vsub.f32 %v1360_v3, %v273_v28  ;;  %v278_v33 = vsub.f32 %v1362_v4, %v274_v29 }
  0x4f   : > { %v279_v34 = vsub.f32 %v1369_v6, %v273_v28  ;;  %v280_v35 = vsub.f32 %v1371_v7, %v274_v29  ;;  %v281_v36 = vsub.f32 %v1377_v10, %v273_v28  ;;  %v282_v37 = vsub.f32 %v1379_v11, %v274_v29  ;;  %v1422_v28 = vld [vmem:[%s1561_s1 + $0x18] sm:$0xff]  ;;  %v1429_v29 = vld [vmem:[%s1561_s1] sm:$0xff] }
  0x50   : > { %v283_v38 = vmul.f32 %v275_v30, %v275_v30  ;;  %v284_v39 = vmul.f32 %v276_v31, %v276_v31  ;;  %v285_v40 = vmul.f32 %v277_v32, %v277_v32  ;;  %v286_v41 = vmul.f32 %v278_v33, %v278_v33 }
  0x51   : > { %v287_v42 = vmul.f32 %v279_v34, %v279_v34  ;;  %v288_v43 = vmul.f32 %v280_v35, %v280_v35  ;;  %v289_v44 = vmul.f32 %v281_v36, %v281_v36  ;;  %v290_v45 = vmul.f32 %v282_v37, %v282_v37 }
  0x52   : > { %v291_v46 = vadd.f32 %v285_v40, %v283_v38  ;;  %v300_v47 = vadd.f32 %v286_v41, %v284_v39 }
  0x54   : > { %v292_v48 = vadd.f32 %v291_v46, %v287_v42  ;;  %v301_v49 = vadd.f32 %v300_v47, %v288_v43 }
  0x56   : > { %v293_v50 = vadd.f32 %v292_v48, %v289_v44  ;;  %v302_v51 = vadd.f32 %v301_v49, %v290_v45 }
  0x58   : > { %v294_v52 = vrot.slane %v293_v50, 4  ;;  %v303_v53 = vrot.slane %v302_v51, 4 }
  0x5a   : > { %v295_v54 = vadd.f32 %v294_v52, %v293_v50  ;;  %v304_v55 = vadd.f32 %v303_v53, %v302_v51 }
  0x5c   : > { %v296_v56 = vrot.slane %v295_v54, 2  ;;  %v305_v57 = vrot.slane %v304_v55, 2 }
  0x5e   : > { %v297_v58 = vadd.f32 %v296_v56, %v295_v54  ;;  %v306_v59 = vadd.f32 %v305_v57, %v304_v55  ;;  %v411_v56 = vld [vmem:[%s1562_s2] sm:$0xff] }
  0x5f   : > { %v494_v57 = vld [vmem:[%s1564_s4] sm:$0xff] }
  0x60   : > { %v298_v60 = vrot.slane %v297_v58, 1  ;;  %v307_v61 = vrot.slane %v306_v59, 1  ;;  %962 = vmatprep.mubr.msk.f32.mxu1 %vm510_vm2, %v494_v57 }
  0x62   : > { %v299_v62 = vadd.f32 %v298_v60, %v297_v58  ;;  %v308_v63 = vadd.f32 %v307_v61, %v306_v59  ;;  %v1198_v58 = vmov 4  }
  0x64   : > { %v309_v8 = vmul.f32 0.03125, %v299_v62  ;;  %v310_v9 = vmul.f32 0.03125, %v308_v63 }
  0x66   : > { %v311_v12 = vadd.f32 1e-06, %v309_v8  ;;  %v312_v13 = vadd.f32 1e-06, %v310_v9 }
  0x68   : > { %1055 = vrsqrt.f32 %v311_v12 }
  0x69   : > { %1057 = vrsqrt.f32 %v312_v13 }
  0x72   : > { %v1056_v14 = vpop.eup %1055 }
  0x73   : > { %v1058_v15 = vpop.eup %1057  ;;  %v1395_v16 = vmul.f32 %v1056_v14, %v275_v30  ;;  %v1397_v17 = vmul.f32 %v1056_v14, %v279_v34  ;;  %v1399_v18 = vmul.f32 %v1056_v14, %v277_v32  ;;  %v1401_v19 = vmul.f32 %v1056_v14, %v281_v36 }
  0x74   : > { %v1403_v20 = vmul.f32 %v1058_v15, %v276_v31  ;;  %v1405_v21 = vmul.f32 %v1058_v15, %v280_v35  ;;  %v1407_v22 = vmul.f32 %v1058_v15, %v278_v33  ;;  %v1409_v23 = vmul.f32 %v1058_v15, %v282_v37 }
  0x75   : > { %v1191_v30 = vmov 0.0|0.0   ;;  %v1193_v31 = vmov 0.0   ;;  %v1194_v32 = vmov 0   ;;  %v1196_v33 = vmov 1  }
  0x76   : > { %v375_v24 = vadd.f32 %v1403_v20, %v1395_v16  ;;  %v381_v25 = vadd.f32 %v1405_v21, %v1397_v17  ;;  %v378_v26 = vadd.f32 %v1407_v22, %v1399_v18  ;;  %v384_v27 = vadd.f32 %v1409_v23, %v1401_v19  ;;  %968 = vmatprep.subr.bf16.mxu0 %v1191_v30 }
  0x77   : > { %957 = vmatprep.mubr.msk.f32.mxu0 %vm1192_vm0, %v1193_v31  ;;  %1044 = vset.pattern.permute.xlu1 %v1194_v32 }
  0x78   : > { %376 = vadd.xlane.f32.xlu0 %v375_v24  ;;  %382 = vadd.xlane.f32.xlu1 %v381_v25  ;;  %v1199_v24 = vmov 5  }
  0x79   : > { %1045 = vset.pattern.permute.xlu0 %v1194_v32 }
  0x7c   : > { %379 = vadd.xlane.f32.xlu0 %v378_v26  ;;  %385 = vadd.xlane.f32.xlu1 %v384_v27 }
  0x8d   : > { %401 = vrot.lane.b32.xlu1 %v1422_v28, %s1190_s15 }
  0x91   : > { %325 = vperm.xlu1 %1044, %v1429_v29  }
  0x92   : > { %395 = vrot.lane.b32.xlu0 %v1429_v29, %s1190_s15  ;;  %s1202_s15 = smov [#allocation5]  }
  0x95   : > { %1046 = vset.pattern.permute.xlu1 %v1196_v33 }
  0x96   : > { %412 = vrot.lane.b32.xlu0 %v1429_v29, %s1195_s11  ;;  %352 = vperm.xlu1 %1046, %v1429_v29  }
  0x9a   : > { %330 = vperm.xlu0 %1045, %v1352_v0   ;;  %356 = vperm.xlu1 %1046, %v1352_v0  }
  0x9e   : > { %335 = vperm.xlu0 %1045, %v1367_v5   ;;  %1047 = vset.pattern.permute.xlu1 %v1194_v32 }
  0x9f   : > { %340 = vperm.xlu1 %1047, %v1422_v28  }
  0xa2   : > { %1048 = vset.pattern.permute.xlu0 %v1196_v33 }
  0xa3   : > { %360 = vperm.xlu0 %1048, %v1367_v5   ;;  %1049 = vset.pattern.permute.xlu1 %v1196_v33 }
  0xa4   : > { %364 = vperm.xlu1 %1049, %v1422_v28  }
  0xa7   : > { %498 = vrot.lane.b32.xlu0 %v1429_v29, %s1197_s12 }
  0xa8   : > { %1050 = vset.pattern.permute.xlu0 %v1198_v58  ;;  %1051 = vset.pattern.permute.xlu1 %v1199_v24 }
  0xab   : > { %v398_v34 = vpop.permute.xlu1 %397  ;;  %502 = vrot.lane.b32.xlu0 %v1367_v5, %s1197_s12 }
  0xaf   : > { %v400_v35 = vpop.permute.xlu1 %399  ;;  %648 = vperm.xlu0 %1050, %v1429_v29  }
  0xb3   : > { %1054 = vset.pattern.permute.xlu0 %v1194_v32 }
 0x105   : > { %v377_v36 = vpop.xlane.xlu0 %376  ;;  %v383_v37 = vpop.xlane.xlu1 %382 }
 0x106   : > { %v387_v38 = vmul.f32 0.00390625, %v377_v36  ;;  %v389_v41 = vmul.f32 0.00390625, %v383_v37 }
 0x108   : > { %v391_v44 = vmul.f32 %v387_v38, %v1429_v29  ;;  %v393_v49 = vmul.f32 %v389_v41, %v1367_v5 }
 0x109   : > { %v380_v39 = vpop.xlane.xlu0 %379  ;;  %v386_v40 = vpop.xlane.xlu1 %385 }
 0x10a   : > { %v388_v42 = vmul.f32 0.00390625, %v380_v39  ;;  %v390_v43 = vmul.f32 0.00390625, %v386_v40  ;;  %v409_v54 = vadd.f32 %v400_v35, %v393_v49  ;;  %v497_v49 = vld [vmem:[%s1564_s4 + $0x18] sm:$0xff] }
 0x10c   : > { %v392_v45 = vmul.f32 %v388_v42, %v1352_v0  ;;  %v394_v46 = vmul.f32 %v390_v43, %v1422_v28 }
 0x10d   : > { %v402_v47 = vpop.permute.xlu1 %401  ;;  %v1449_v48 = vpop.permute.xlu0 %395 }
 0x10e   : > { %v407_v50 = vadd.f32 %v1449_v48, %v391_v44  ;;  %v408_v51 = vadd.f32 %v398_v34, %v392_v45  ;;  %v410_v52 = vadd.f32 %v402_v47, %v394_v46 }
 0x110   : > { %v969_v53 = vpack.c.bf16 %v408_v51, %v407_v50  ;;  %v972_v55 = vpack.c.bf16 %v410_v52, %v409_v54  ;;  %v646_v50 = vld [vmem:[%s1563_s3] sm:$0xff]  ;;  %v1201_v51 = vmov 6  }
 0x111   : > { %v326_v59 = vpop.permute.xlu1 %325  ;;  %v413_v61 = vpop.permute.xlu0 %412 }
 0x112   : > { %970 = vmatpush3.bf16.msra.mxu0 %v969_v53  ;;  %v344_v5 = vmul.f32 %v326_v59, %v1403_v20  ;;  %v343_v26 = vmul.f32 %v326_v59, %v1395_v16 }
 0x113   : > { %971 = vmatprep.subr.bf16.mxu0 %v1191_v30 }
 0x115   : > { %v353_v60 = vpop.permute.xlu1 %352 }
 0x116   : > { %973 = vmatpush3.bf16.msra.mxu0 %v972_v55  ;;  %v368_v36 = vadd.f32 %v353_v60, %v344_v5  ;;  %v367_v39 = vadd.f32 %v353_v60, %v343_v26 }
 0x119   : > { %958 = vmatmul.mubr.msk.f32.vlgmr.msra.gmra.mrb[0].mxu0 %vm415_vm1, %v411_v56  ;;  %v331_v63 = vpop.permute.xlu0 %330  ;;  %v357_v12 = vpop.permute.xlu1 %356 }
 0x11a   : > { %v346_v25 = vmul.f32 %v331_v63, %v1407_v22  ;;  %v345_v27 = vmul.f32 %v331_v63, %v1399_v18 }
 0x11c   : > { %v370_v37 = vadd.f32 %v357_v12, %v346_v25  ;;  %v369_v40 = vadd.f32 %v357_v12, %v345_v27 }
 0x11d   : > { %v336_v15 = vpop.permute.xlu0 %335 }
 0x11e   : > { %v341_v14 = vpop.permute.xlu1 %340  ;;  %v348_v33 = vmul.f32 %v336_v15, %v1405_v21  ;;  %v347_v20 = vmul.f32 %v336_v15, %v1397_v17  ;;  %v974_v44 = vpack.c.bf16 %v370_v37, %v368_v36  ;;  %v495_v21 = vld [vmem:[%s1564_s4 + $0x8] sm:$0xff]  ;;  %v496_v17 = vld [vmem:[%s1564_s4 + $0x10] sm:$0xff] }
 0x11f   : > { %v350_v30 = vmul.f32 %v341_v14, %v1409_v23  ;;  %v349_v41 = vmul.f32 %v341_v14, %v1401_v19  ;;  %v976_v23 = vpack.c.bf16 %v369_v40, %v367_v39 }
 0x122   : > { %v361_v35 = vpop.permute.xlu0 %360 }
 0x123   : > { %v365_v34 = vpop.permute.xlu1 %364  ;;  %v372_v43 = vadd.f32 %v361_v35, %v348_v33  ;;  %v371_v46 = vadd.f32 %v361_v35, %v347_v20 }
 0x124   : > { %v374_v16 = vadd.f32 %v365_v34, %v350_v30  ;;  %v373_v45 = vadd.f32 %v365_v34, %v349_v41 }
 0x126   : > { %v978_v47 = vpack.c.bf16 %v374_v16, %v372_v43  ;;  %v980_v19 = vpack.c.bf16 %v373_v45, %v371_v46  ;;  %v499_v60 = vpop.permute.xlu0 %498 }
 0x12a   : > { %v503_v12 = vpop.permute.xlu0 %502 }
 0x1ec   : > { %v485_v62 = vpop.f32.mrb[0].mxu0 }
 0x1ed   : > { %v486_v8 = vadd.f32 %v485_v62, %v413_v61  ;;  %v959_v9 = vpop.f32.mrb[1].mxu0 }
 0x1ef   : > { %v490_v13 = vmul.f32 0.70710677, %v486_v8  ;;  %v489_v22 = vmul.f32 0.5, %v486_v8 }
 0x1f1   : > { %1059 = verf.f32 %v490_v13 }
 0x1fb   : > { %v1060_v38 = vpop.eup %1059 }
 0x1fc   : > { %v492_v42 = vadd.f32 1.0, %v1060_v38 }
 0x1fe   : > { %v493_v18 = vmul.f32 %v492_v42, %v489_v22  ;;  %v649_v22 = vpop.permute.xlu0 %648 }
 0x200   : > { %633 = vrot.lane.b32.xlu1 %v493_v18, %s1200_s16  ;;  %960 = vmatprep.subr.mxu1 %v493_v18  ;;  %s1123_s16 = sshll.u32 %s1202_s15, 4  ;;  %s1124_s16 = int_to_ptr.vmem [resolvable:$false] %s1123_s16 }
 0x201   : > { %961 = vmatpush3.msra.mxu1 %v493_v18  ;;  %s1125_s29 = scalar_lea.vmem %s1124_s16, 2048  ;;  %p1126_p8 = scmp.lt.s32.totalorder %s1507_s17, %s1124_s16 }
 0x202   : > { %963 = vmatmul.mubr.msk.f32.vlgmr.msra.gmra.mrb[0].mxu1 %vm510_vm2, %v495_v21  ;;  %975 = vmatprep.subr.bf16.mxu1 %v974_v44  ;;  %p1127_p10 = scmp.lt.s32.totalorder %s1125_s29, %s1119_s14 }
 0x203   : > { %965 = vmatprep.mubr.msk.f32.mxu1 %vm510_vm2, %v496_v17  ;;  %977 = vmatpush1.bf16.msra.mxu1 %v976_v23 }
 0x204   : > { %979 = vmatprep.subr.bf16.mxu1 %v978_v47  ;;  %500 = vrot.lane.b32.xlu1 %v1352_v0, %s1197_s12  ;;  %p1128_p0 = por %p1127_p10, %p1126_p8 }
 0x206   : > { %966 = vmatmul.mubr.msk.f32.gmra.mrb[2].mxu1 %vm510_vm2, %v497_v49  ;;  %p1129_p2 = pnand %p1128_p0, %p1122_p13 }
 0x207   : > { %981 = vmatpush1.bf16.msra.mxu1 %v980_v19  ;;  %718 = vmatprep.mubr.f32.mxu1 %v1193_v31 }
 0x208   : > { %504 = vrot.lane.b32.xlu1 %v1422_v28, %s1197_s12  ;;  %s825_s12 = scalar_lea.sflag [#allocation4], %s1339_s23 }
 0x20a   : > { %929 = vmatmul.mubr.msk.f32.vlgmr.msra.gmra.mrb[4].mxu1 %vm415_vm1, %v646_v50 }
 0x20c   : > { %736 = vperm.xlu1 %1051, %v1429_v29  }
 0x210   : > { %1052 = vset.pattern.permute.xlu1 %v1201_v51 }
 0x272   : > { %v634_v0 = vpop.permute.xlu1 %633 }
 0x273   : > { %v636_v52 = vmul.f32 %v634_v0, %v1429_v29 }
 0x275   : > { %v638_v53 = vsel %vm637_vm3, %v636_v52, 0.0 }
 0x276   : > { %v639_v54 = vrot.slane %v638_v53, 4  ;;  %v501_v28 = vpop.permute.xlu1 %500 }
 0x278   : > { %v640_v31 = vadd.f32 %v639_v54, %v638_v53 }
 0x27a   : > { %v641_v55 = vrot.slane %v640_v31, 2  ;;  %v505_v9 = vpop.permute.xlu1 %504 }
 0x27c   : > { %v642_v56 = vadd.f32 %v641_v55, %v640_v31 }
 0x27e   : > { %v643_v57 = vrot.slane %v642_v56, 1 }
 0x280   : > { %v644_v58 = vadd.f32 %v643_v57, %v642_v56 }
 0x282   : > { %v645_v59 = vadd.f32 %v644_v58, %v1449_v48 }
 0x284   : > { %755 = vperm.xlu1 %1052, %v645_v59  }
 0x288   : > { %1053 = vset.pattern.permute.xlu1 %v1194_v32 }
 0x28b   : > { %v737_v19 = vpop.permute.xlu1 %736 }
 0x2d5   : > { %v964_v61 = vpop.f32.mrb[0].mxu1 }
 0x2d6   : > { %v595_v62 = vadd.f32 %v964_v61, %v501_v28  ;;  %v589_v63 = vpop.f32.mrb[1].mxu1 }
 0x2d7   : > { %v590_v8 = vadd.f32 %v589_v63, %v499_v60 }
 0x2d8   : > { %v926_v29 = vmul.f32 -1.442695, %v595_v62 }
 0x2d9   : > { %v925_v13 = vmul.f32 -1.442695, %v590_v8  ;;  %v967_v14 = vpop.f32.mrb[2].mxu1 }
 0x2da   : > { %1061 = vpow2.f32 %v926_v29  ;;  %v605_v15 = vadd.f32 %v967_v14, %v505_v9  ;;  %v599_v24 = vpop.f32.mrb[3].mxu1 }
 0x2db   : > { %1063 = vpow2.f32 %v925_v13  ;;  %v600_v5 = vadd.f32 %v599_v24, %v503_v12 }
 0x2dc   : > { %v928_v48 = vmul.f32 -1.442695, %v605_v15  ;;  %v772_v15 = vlaneseq }
 0x2dd   : > { %v927_v25 = vmul.f32 -1.442695, %v600_v5  ;;  %v720_v26 = vpop.f32.mrb[4].mxu1 }
 0x2de   : > { %1065 = vpow2.f32 %v928_v48  ;;  %v722_v32 = vpop.f32.mrb[5].mxu1  ;;  %v721_v42 = vadd.f32 %v720_v26, %v649_v22  ;;  %v773_v24 = vshrl.u32 %v772_v15, 7 }
 0x2df   : > { %1067 = vpow2.f32 %v927_v25  ;;  %v723_v16 = vadd.f32 %v722_v32, %v649_v22 }
 0x2e0   : > { %v727_v43 = vmul.f32 0.70710677, %v721_v42  ;;  %v725_v21 = vmul.f32 0.5, %v721_v42  ;;  %v774_v48 = vsub.s32 0, %v773_v24 }
 0x2e1   : > { %v728_v18 = vmul.f32 0.70710677, %v723_v16  ;;  %v726_v46 = vmul.f32 0.5, %v723_v16 }
 0x2e4   : > { %v1062_v27 = vpop.eup %1061 }
 0x2e5   : > { %v1064_v30 = vpop.eup %1063  ;;  %v621_v33 = vadd.f32 1.0, %v1062_v27 }
 0x2e6   : > { %v620_v34 = vadd.f32 1.0, %v1064_v30 }
 0x2e7   : > { %1069 = vrcp.f32 %v621_v33 }
 0x2e8   : > { %v1066_v35 = vpop.eup %1065  ;;  %1071 = vrcp.f32 %v620_v34 }
 0x2e9   : > { %v1068_v36 = vpop.eup %1067  ;;  %v623_v37 = vadd.f32 1.0, %v1066_v35 }
 0x2ea   : > { %v622_v38 = vadd.f32 1.0, %v1068_v36 }
 0x2eb   : > { %1073 = vrcp.f32 %v623_v37 }
 0x2ec   : > { %1075 = vrcp.f32 %v622_v38 }
 0x2ed   : > { %1077 = verf.f32 %v727_v43 }
 0x2ee   : > { %1079 = verf.f32 %v728_v18 }
 0x2f1   : > { %v1070_v39 = vpop.eup %1069 }
 0x2f2   : > { %v1072_v40 = vpop.eup %1071  ;;  %795 = vperm.xlu1 %1053, %v1070_v39  }
 0x2f3   : > { %790 = vperm.xlu0 %1054, %v1072_v40  }
 0x2f5   : > { %v1074_v41 = vpop.eup %1073 }
 0x2f6   : > { %v1076_v20 = vpop.eup %1075 }
 0x2f7   : > { %800 = vperm.xlu1 %1053, %v1076_v20   ;;  %805 = vperm.xlu0 %1054, %v1074_v41   ;;  %v1078_v44 = vpop.eup %1077 }
 0x2f8   : > { %v1080_v23 = vpop.eup %1079  ;;  %v731_v45 = vadd.f32 1.0, %v1078_v44 }
 0x2f9   : > { %v732_v47 = vadd.f32 1.0, %v1080_v23 }
 0x2fa   : > { %v733_v17 = vmul.f32 %v731_v45, %v725_v21 }
 0x2fb   : > { %v734_v49 = vmul.f32 %v732_v47, %v726_v46 }
 0x2fc   : > { %v739_v50 = vmul.f32 %v737_v19, %v733_v17 }
 0x2fd   : > { %v740_v51 = vmul.f32 %v737_v19, %v734_v49 }
 0x2fe   : > { %v741_v0 = vrot.slane %v739_v50, 4 }
 0x2ff   : > { %v747_v52 = vrot.slane %v740_v51, 4 }
 0x300   : > { %v742_v53 = vadd.f32 %v741_v0, %v739_v50 }
 0x301   : > { %v748_v54 = vadd.f32 %v747_v52, %v740_v51 }
 0x302   : > { %v743_v31 = vrot.slane %v742_v53, 2 }
 0x303   : > { %v749_v55 = vrot.slane %v748_v54, 2  ;;  %v756_v60 = vpop.permute.xlu1 %755 }
 0x304   : > { %v744_v56 = vadd.f32 %v743_v31, %v742_v53 }
 0x305   : > { %v750_v57 = vadd.f32 %v749_v55, %v748_v54 }
 0x306   : > { %v745_v58 = vrot.slane %v744_v56, 1 }
 0x307   : > { %v751_v59 = vrot.slane %v750_v57, 1 }
 0x308   : > { %v746_v28 = vadd.f32 %v745_v58, %v744_v56 }
 0x309   : > { %v752_v61 = vadd.f32 %v751_v59, %v750_v57 }
 0x30a   : > { %v758_v62 = vadd.f32 %v756_v60, %v746_v28 }
 0x30b   : > { %v759_v63 = vadd.f32 %v756_v60, %v752_v61 }
 0x30c   : > { %v930_v8 = vmul.f32 -1.442695, %v758_v62 }
 0x30d   : > { %v931_v9 = vmul.f32 -1.442695, %v759_v63 }
 0x30e   : > { %1081 = vpow2.f32 %v930_v8 }
 0x30f   : > { %1083 = vpow2.f32 %v931_v9 }
 0x318   : > { %v1082_v29 = vpop.eup %1081 }
 0x319   : > { %v1084_v12 = vpop.eup %1083  ;;  %v766_v13 = vadd.f32 1.0, %v1082_v29 }
 0x31a   : > { %v767_v14 = vadd.f32 1.0, %v1084_v12 }
 0x31b   : > { %1085 = vrcp.f32 %v766_v13 }
 0x31c   : > { %1087 = vrcp.f32 %v767_v14 }
 0x325   : > { %v1086_v5 = vpop.eup %1085 }
 0x326   : > { %v1088_v25 = vpop.eup %1087  ;;  %v775_v26 = vrot.slane %v1086_v5, %v774_v48 }
 0x327   : > { %v779_v32 = vrot.slane %v1088_v25, %v774_v48 }
 0x328   : > { %v782_v27 = vmul.f32 %v775_v26, %v1360_v3  ;;  %v780_v34 = vmul.f32 %v775_v26, %v1354_v1  ;;  %v784_v1 = vmul.f32 %v775_v26, %v1369_v6  ;;  %v786_v3 = vmul.f32 %v775_v26, %v1377_v10 }
 0x329   : > { %v783_v30 = vmul.f32 %v779_v32, %v1362_v4  ;;  %v781_v35 = vmul.f32 %v779_v32, %v1358_v2  ;;  %v785_v2 = vmul.f32 %v779_v32, %v1371_v7  ;;  %v787_v4 = vmul.f32 %v779_v32, %v1379_v11 }
 0x371   : > { %v796_v33 = vpop.permute.xlu1 %795 }
 0x372   : > { %v810_v36 = vmul.f32 %v796_v33, %v782_v27  ;;  %v811_v37 = vmul.f32 %v796_v33, %v783_v30  ;;  %v791_v38 = vpop.permute.xlu0 %790 }
 0x373   : > { %v808_v39 = vmul.f32 %v791_v38, %v780_v34  ;;  %v809_v40 = vmul.f32 %v791_v38, %v781_v35 }
 0x374   : > { %818 = vst [vmem:[%s242_s13 + $0x10] sm:$0xff] %v810_v36  ;;  %819 = vst [vmem:[%s242_s13 + $0x18] sm:$0xff] %v811_v37 }
 0x375   : > { %816 = vst [vmem:[%s242_s13] sm:$0xff] %v808_v39  ;;  %817 = vst [vmem:[%s242_s13 + $0x8] sm:$0xff] %v809_v40 }
 0x376   : > { %v801_v41 = vpop.permute.xlu1 %800  ;;  %v806_v20 = vpop.permute.xlu0 %805 }
 0x377   : > { %v812_v22 = vmul.f32 %v801_v41, %v784_v1  ;;  %v813_v42 = vmul.f32 %v801_v41, %v785_v2  ;;  %v814_v6 = vmul.f32 %v806_v20, %v786_v3  ;;  %v815_v16 = vmul.f32 %v806_v20, %v787_v4 }
 0x379   : > { %820 = vst [vmem:[%s242_s13 + $0x20] sm:$0xff] %v812_v22  ;;  %821 = vst [vmem:[%s242_s13 + $0x28] sm:$0xff] %v813_v42 }
 0x37a   : > { %822 = vst [vmem:[%s242_s13 + $0x30] sm:$0xff] %v814_v6  ;;  %823 = vst [vmem:[%s242_s13 + $0x38] sm:$0xff] %v815_v16 }
 0x37b   : > { %1132 = shalt.err (!%p1129_p2)
}
 0x37c   : > { %s1133_s8 = scalar_lea.hbm %s1516_s28, 1024  ;;  %s1137_s10 = scalar_lea.hbm %s1565_s5, 2048 }
 0x37d   : > { %p1134_p4 = scmp.ne.s32.totalorder %s1516_s28, %s1133_s8  ;;  %p1138_p9 = scmp.lt.u32.totalorder %s1516_s28, %s1565_s5 }
 0x37e   : > { %p1139_p1 = scmp.lt.u32.totalorder %s1137_s10, %s1133_s8  ;;  %p1141_p6 = scmp.lt.u32.totalorder %s1133_s8, %s1516_s28 }
 0x37f   : > { %p1135_p5 = pnand %p1134_p4, %p1572_p11 }
 0x380   : > { %p1140_p3 = por %p1139_p1, %p1138_p9 }
 0x381   : > { %p1136_p7 = pneg %p1135_p5 }
 0x382   : > { %p1142_p12 = por %p1141_p6, %p1140_p3 }
 0x384   : > { %p1143_p13 = pnand %p1142_p12, %p1136_p7 }
 0x386   : > { %1146 = shalt.err (!%p1143_p13)
}
 0x387   : > { %s1203_s26 = smov 256   ;;  %s1204_s22 = smov 16  }
 0x388   : > { %984 = dma.vmem_to_hbm [thread:$0]  (%p1572_p11), %s1507_s17, 1024, %s1516_s28, %s825_s12, %s1203_s26, %s1203_s26, %s1204_s22  }
 0x389 PF: > { %s853_s25 = sand.u32 1, %s1173_s18   ;;  %p1573_p8 = scmp.ne.s32.totalorder %s1570_s6, 0 }
 0x38a   : > { %p1574_p10 = scmp.ge.s32.totalorder %s1185_s21, 2  ;;  %s854_s14 = scalar_lea.sflag [#allocation4], %s853_s25 }
 0x38c   : > { %p991_p0 = pnand %p1574_p10, %p1573_p8 }
 0x38e   : > { %1168 = dma.done.wait (!%p991_p0), %s854_s14, 1024  }
 0x38f   : > { %1170 = vsyncadd (!%p991_p0), %s854_s14, 4294966272  ;;  %p18_p2 = scmp.ge.s32.totalorder %s1260_s24, 4   ;;  %s1575_s18 = smov %s1177_s19 }
 0x390   : > { %s1576_s19 = smov %s1181_s20  ;;  %s1577_s20 = smov %s1272_s27 }
 0x391   : > { %s1578_s21 = smov %s1260_s24  ;;  %20 = sbr.rel (!%p18_p2) target bundleno = 5 (0x5), region = 85 }
 0x398   :  { %859 = vsyncpa [#allocation3], 1 }
 0x399   :  { %861 = vsyncpa [#allocation3 + $0x1], 1 }
 0x39a   :  { %862 = vsyncpa [#allocation4], 1 }
 0x39b   :  { %864 = vsyncpa [#allocation4 + $0x1], 1 }

</bundles_post_ra>
